<compile_context>
chip_gen: v7x
topology: tpu7x:2x2x1
jax: 0.10.0
libtpu: 0.0.40
codegen_flags: <defaults>
</compile_context>

<pallas_src>
import jax
import jax.numpy as jnp
from jax.experimental import pallas as pl
from jax.experimental.pallas import tpu as pltpu


# ----------------------------- Pallas hot path ------------------------------

def _make_sa_mlp_kernel(num_layers, tp, nsample):
    def kernel(*refs):
        x_ref = refs[0]                        # (1, TP, S, Cin)  bf16
        o_ref = refs[-1]                       # (1, Cout, TP)    f32
        cin = x_ref.shape[-1]
        # point-major rows; merging the two leading (sublane) dims is free.
        h = x_ref[0].reshape(tp * nsample, cin)
        for l in range(num_layers):
            w = refs[1 + 2 * l][...]           # (C_l, C_{l+1})   bf16
            b = refs[2 + 2 * l][...]           # (1,  C_{l+1})    f32
            h = jnp.dot(h, w, preferred_element_type=jnp.float32) + b
            h = jnp.maximum(h, 0.0)            # ReLU in f32
            if l + 1 < num_layers:
                h = h.astype(jnp.bfloat16)     # feed MXU in bf16
        cout = h.shape[-1]
        # F.max_pool2d(kernel=[1, nsample]) == max over the sample axis;
        # single sublane reduction per point tile.
        pooled = jnp.max(h.reshape(tp, nsample, cout), axis=1)    # (TP, Cout)
        # channels-first store: lane dim = point tile (lane-dense for real P).
        o_ref[0] = jnp.transpose(pooled)                          # (Cout, TP)
    return kernel


def _choose_point_tile(npoint, nsample, cmax):
    """Pick TP so the output block lane dim is 128-aligned (or the full dim)
    and the per-step working set stays small (mandatory on v7x's 64 MiB)."""
    if npoint < 128 or npoint % 128 != 0:
        return npoint                      # full dim (small / odd configs)
    tp = 128
    budget = 4 << 20                       # ~4 MiB f32 intermediate per block
    while npoint % (tp * 2) == 0 and (tp * 2) * nsample * cmax * 4 <= budget:
        tp *= 2
    return tp


def sa_mlp_maxpool(grouped, weights, biases):
    """grouped: (B, npoint, nsample, C_in) f32 -> (B, C_out, npoint) f32."""
    B, P, S, Cin = grouped.shape
    Cout = weights[-1].shape[1]
    cmax = max(Cin, max(max(w.shape) for w in weights))
    TP = _choose_point_tile(P, S, cmax)
    assert P % TP == 0

    x = grouped.astype(jnp.bfloat16)       # halve HBM traffic of the big operand

    in_specs = [pl.BlockSpec((1, TP, S, Cin), lambda b, p: (b, p, 0, 0))]
    operands = [x]
    for w, bias in zip(weights, biases):
        wb = w.astype(jnp.bfloat16)
        in_specs.append(pl.BlockSpec(wb.shape, lambda b, p: (0, 0)))
        in_specs.append(pl.BlockSpec(bias.shape, lambda b, p: (0, 0)))
        operands.extend([wb, bias])

    flops = 2 * B * P * S * sum(w.shape[0] * w.shape[1] for w in weights)
    bytes_accessed = int(
        x.size * 2
        + sum(w.size * 2 + b.size * 4 for w, b in zip(weights, biases))
        + B * Cout * P * 4)

    kernel = _make_sa_mlp_kernel(len(weights), TP, S)
    return pl.pallas_call(
        kernel,
        out_shape=jax.ShapeDtypeStruct((B, Cout, P), jnp.float32),
        grid=(B, P // TP),
        in_specs=in_specs,
        out_specs=pl.BlockSpec((1, Cout, TP), lambda b, p: (b, 0, p)),
        compiler_params=pltpu.CompilerParams(
            dimension_semantics=("parallel", "parallel"),
            vmem_limit_bytes=32 * 1024 * 1024),
        cost_estimate=pl.CostEstimate(
            flops=flops, transcendentals=0, bytes_accessed=bytes_accessed),
    )(*operands)


# --------------------------- plain-JAX glue (FPS / grouping) ----------------

def furthest_point_sample(xyz, npoint):
    # TODO(synk): sequential data-dependent argmax loop has no clean Pallas
    # equivalent; implemented in plain JAX glue.
    B, N, _ = xyz.shape

    def body(i, state):
        dists, farthest, idx = state
        idx = idx.at[:, i].set(farthest)
        centroid = jax.vmap(lambda pts, f: pts[f])(xyz, farthest)    # (B, 3)
        d = jnp.sum((xyz - centroid[:, None, :]) ** 2, axis=-1)      # (B, N)
        dists = jnp.minimum(dists, d)
        farthest = jnp.argmax(dists, axis=-1).astype(jnp.int32)
        return dists, farthest, idx

    init = (jnp.full((B, N), 1e10, jnp.float32),
            jnp.zeros((B,), jnp.int32),
            jnp.zeros((B, npoint), jnp.int32))
    _, _, idx = jax.lax.fori_loop(0, npoint, body, init)
    return idx


def ball_query(radius, nsample, xyz, new_xyz):
    B, N, _ = xyz.shape
    sqd = jnp.sum((new_xyz[:, :, None, :] - xyz[:, None, :, :]) ** 2, axis=-1)
    arange = jnp.broadcast_to(jnp.arange(N, dtype=jnp.int32), sqd.shape)
    idx = jnp.where(sqd < radius * radius, arange, N)   # strict <, like CUDA ref
    idx = jnp.sort(idx, axis=-1)[:, :, :nsample]
    first = idx[:, :, :1]
    # "no neighbor" guard: never let the N sentinel reach the gather (OOB).
    first = jnp.where(first == N, 0, first)
    return jnp.where(idx == N, first, idx)


def query_and_group(xyz, new_xyz, features, radius, nsample):
    # TODO(synk): data-dependent gather (ball query / grouping) stays in plain
    # JAX; fusing it into the kernel via PrefetchScalarGridSpec-driven DMA
    # gather would remove one more HBM round trip.
    idx = ball_query(radius, nsample, xyz, new_xyz)               # (B, P, S)
    gather = jax.vmap(lambda pts, id_: pts[id_])
    grouped_xyz = gather(xyz, idx) - new_xyz[:, :, None, :]       # (B, P, S, 3)
    grouped_feat = gather(features, idx)                          # (B, P, S, C)
    # use_xyz=True: concat relative xyz (3) then descriptors (C) on channels
    return jnp.concatenate([grouped_xyz, grouped_feat], axis=-1)


def pointnet_sa_forward(xyz, features, npoint, radii, nsamples, params):
    """Mirrors _PointnetSAModuleBase.forward.

    xyz: (B, N, 3), features: (B, N, C)
    returns new_xyz (B, npoint, 3), new_features (B, sum_k C_out_k, npoint)
    """
    fps_idx = furthest_point_sample(xyz, npoint)
    new_xyz = jax.vmap(lambda pts, id_: pts[id_])(xyz, fps_idx)   # (B, npoint, 3)

    new_features_list = []
    for radius, nsample, (weights, biases) in zip(radii, nsamples, params):
        grouped = query_and_group(xyz, new_xyz, features, radius, nsample)
        feats = sa_mlp_maxpool(grouped, weights, biases)          # (B, Cout, P)
        new_features_list.append(feats)
    return new_xyz, jnp.concatenate(new_features_list, axis=1)


# ------------------------------------ main -----------------------------------

if __name__ == "__main__":
    key = jax.random.PRNGKey(0)
    B, N, C = 2, 64, 4
    npoint = 8
    radii = [0.2, 0.4]
    nsamples = [8, 16]
    mlps = [[3 + C, 16, 32], [3 + C, 16, 64]]   # per-grouper shared MLP widths

    kx, kf, kw = jax.random.split(key, 3)
    xyz = jax.random.uniform(kx, (B, N, 3), jnp.float32)
    features = jax.random.normal(kf, (B, N, C), jnp.float32)

    # Deterministic parameter init: Conv2d 1x1 weight (C_in, C_out) + bias.
    # BatchNorm2d at init folds to identity; ReLU applied after each layer.
    params = []
    for mlp in mlps:
        weights, biases = [], []
        for li in range(len(mlp) - 1):
            kw, k1 = jax.random.split(kw)
            w = 0.1 * jax.random.normal(k1, (mlp[li], mlp[li + 1]), jnp.float32)
            b = jnp.zeros((1, mlp[li + 1]), jnp.float32)
            weights.append(w)
            biases.append(b)
        params.append((weights, biases))

    new_xyz, new_features = pointnet_sa_forward(
        xyz, features, npoint, radii, nsamples, params)
    jax.block_until_ready((new_xyz, new_features))

    assert new_xyz.shape == (B, npoint, 3)
    assert new_features.shape == (B, sum(m[-1] for m in mlps), npoint)

    # Pure-JAX reference of the MLP + max-pool path.  The kernel feeds the MXU
    # in bf16, so the reference uses the same bf16-cast operands with f32
    # accumulation; the only remaining difference is summation order.
    ref_list = []
    for radius, nsample, (weights, biases) in zip(radii, nsamples, params):
        grouped = query_and_group(xyz, new_xyz, features, radius, nsample)
        h = grouped.astype(jnp.bfloat16)
        for li, (w, b) in enumerate(zip(weights, biases)):
            h = jnp.einsum('bpsc,cd->bpsd', h, w.astype(jnp.bfloat16),
                           preferred_element_type=jnp.float32)
            h = jnp.maximum(h + b[0], 0.0)
            if li + 1 < len(weights):
                h = h.astype(jnp.bfloat16)
        ref_list.append(jnp.transpose(jnp.max(h, axis=2), (0, 2, 1)))
    ref = jnp.concatenate(ref_list, axis=1)
    assert jnp.allclose(new_features, ref, rtol=5e-2, atol=5e-2), (
        float(jnp.max(jnp.abs(new_features - ref))))

    print("KERNEL_OK")
</pallas_src>

<mosaic_0001>
module attributes {stable_mosaic.version = 11 : i64} {
  func.func @kernel(%arg0: i32, %arg1: i32, %arg2: memref<1x8x8x7xbf16, #tpu.memory_space<vmem>>, %arg3: memref<7x16xbf16, #tpu.memory_space<vmem>>, %arg4: memref<1x16xf32, #tpu.memory_space<vmem>>, %arg5: memref<16x32xbf16, #tpu.memory_space<vmem>>, %arg6: memref<1x32xf32, #tpu.memory_space<vmem>>, %arg7: memref<1x32x8xf32, #tpu.memory_space<vmem>>) attributes {dimension_semantics = [#tpu.dimension_semantics<parallel>, #tpu.dimension_semantics<parallel>], iteration_bounds = array<i64: 2, 1>, scalar_prefetch = 0 : i64, scratch_operands = 0 : i64, tpu.core_type = #tpu.core_type<tc>, window_params = [{transform_indices = @transform_0, window_bounds = array<i64: 1, 8, 8, 7>}, {pipeline_mode = #tpu.pipeline_mode<synchronous>, transform_indices = @transform_1, window_bounds = array<i64: 7, 16>}, {pipeline_mode = #tpu.pipeline_mode<synchronous>, transform_indices = @transform_2, window_bounds = array<i64: 1, 16>}, {pipeline_mode = #tpu.pipeline_mode<synchronous>, transform_indices = @transform_3, window_bounds = array<i64: 16, 32>}, {pipeline_mode = #tpu.pipeline_mode<synchronous>, transform_indices = @transform_4, window_bounds = array<i64: 1, 32>}, {transform_indices = @transform_5, window_bounds = array<i64: 1, 32, 8>}]} {
    %c0 = arith.constant 0 : index
    %c0_0 = arith.constant 0 : index
    %c0_1 = arith.constant 0 : index
    %c0_2 = arith.constant 0 : index
    %0 = vector.load %arg2[%c0, %c0_0, %c0_1, %c0_2] : memref<1x8x8x7xbf16, #tpu.memory_space<vmem>>, vector<1x8x8x7xbf16>
    %1 = vector.shape_cast %0 : vector<1x8x8x7xbf16> to vector<8x8x7xbf16>
    %2 = vector.shape_cast %1 : vector<8x8x7xbf16> to vector<64x7xbf16>
    %c0_3 = arith.constant 0 : index
    %c0_4 = arith.constant 0 : index
    %3 = vector.load %arg3[%c0_3, %c0_4] : memref<7x16xbf16, #tpu.memory_space<vmem>>, vector<7x16xbf16>
    %c0_5 = arith.constant 0 : index
    %c0_6 = arith.constant 0 : index
    %4 = vector.load %arg4[%c0_5, %c0_6] : memref<1x16xf32, #tpu.memory_space<vmem>>, vector<1x16xf32>
    %cst = arith.constant dense<0.000000e+00> : vector<64x16xf32>
    %5 = tpu.matmul %2, %3, %cst {dimension_numbers = #tpu.dot_dimension_numbers<[1], [0], [0], [1], [0, 0, 1, 1], [], []>} : vector<64x7xbf16>, vector<7x16xbf16>, vector<64x16xf32> -> vector<64x16xf32>
    %6 = vector.broadcast %4 : vector<1x16xf32> to vector<64x16xf32>
    %7 = arith.addf %5, %6 : vector<64x16xf32>
    %cst_7 = arith.constant 0.000000e+00 : f32
    %8 = vector.broadcast %cst_7 : f32 to vector<64x16xf32>
    %9 = arith.maximumf %7, %8 : vector<64x16xf32>
    %10 = arith.truncf %9 : vector<64x16xf32> to vector<64x16xbf16>
    %c0_8 = arith.constant 0 : index
    %c0_9 = arith.constant 0 : index
    %11 = vector.load %arg5[%c0_8, %c0_9] : memref<16x32xbf16, #tpu.memory_space<vmem>>, vector<16x32xbf16>
    %c0_10 = arith.constant 0 : index
    %c0_11 = arith.constant 0 : index
    %12 = vector.load %arg6[%c0_10, %c0_11] : memref<1x32xf32, #tpu.memory_space<vmem>>, vector<1x32xf32>
    %cst_12 = arith.constant dense<0.000000e+00> : vector<64x32xf32>
    %13 = tpu.matmul %10, %11, %cst_12 {dimension_numbers = #tpu.dot_dimension_numbers<[1], [0], [0], [1], [0, 0, 1, 1], [], []>} : vector<64x16xbf16>, vector<16x32xbf16>, vector<64x32xf32> -> vector<64x32xf32>
    %14 = vector.broadcast %12 : vector<1x32xf32> to vector<64x32xf32>
    %15 = arith.addf %13, %14 : vector<64x32xf32>
    %cst_13 = arith.constant 0.000000e+00 : f32
    %16 = vector.broadcast %cst_13 : f32 to vector<64x32xf32>
    %17 = arith.maximumf %15, %16 : vector<64x32xf32>
    %18 = vector.shape_cast %17 : vector<64x32xf32> to vector<8x8x32xf32>
    %cst_14 = arith.constant dense<0xFF800000> : vector<8x32xf32>
    %19 = vector.multi_reduction <maximumf>, %18, %cst_14 [1] : vector<8x8x32xf32> to vector<8x32xf32>
    %20 = tpu.transpose %19, [1, 0] : vector<8x32xf32> -> vector<32x8xf32>
    %c0_15 = arith.constant 0 : index
    %c0_16 = arith.constant 0 : index
    %c0_17 = arith.constant 0 : index
    %21 = vector.load %arg7[%c0_15, %c0_16, %c0_17] : memref<1x32x8xf32, #tpu.memory_space<vmem>>, vector<1x32x8xf32>
    %22 = vector.shape_cast %21 : vector<1x32x8xf32> to vector<32x8xf32>
    %23 = vector.shape_cast %20 : vector<32x8xf32> to vector<1x32x8xf32>
    tpu.vector_store %arg7[%c0_15, %c0_16, %c0_17], %23 {strides = array<i32>} : memref<1x32x8xf32, #tpu.memory_space<vmem>>, vector<1x32x8xf32>,
    return
  }
  func.func @transform_0(%arg0: i32, %arg1: i32) -> (i32, i32, i32, i32) {
    %c0_i32 = arith.constant 0 : i32
    %c0_i32_0 = arith.constant 0 : i32
    %c0_i32_1 = arith.constant 0 : i32
    return %arg0, %arg1, %c0_i32, %c0_i32_0 : i32, i32, i32, i32
  }
  func.func @transform_1(%arg0: i32, %arg1: i32) -> (i32, i32) {
    %c0_i32 = arith.constant 0 : i32
    %c0_i32_0 = arith.constant 0 : i32
    %c0_i32_1 = arith.constant 0 : i32
    return %c0_i32, %c0_i32_0 : i32, i32
  }
  func.func @transform_2(%arg0: i32, %arg1: i32) -> (i32, i32) {
    %c0_i32 = arith.constant 0 : i32
    %c0_i32_0 = arith.constant 0 : i32
    %c0_i32_1 = arith.constant 0 : i32
    return %c0_i32, %c0_i32_0 : i32, i32
  }
  func.func @transform_3(%arg0: i32, %arg1: i32) -> (i32, i32) {
    %c0_i32 = arith.constant 0 : i32
    %c0_i32_0 = arith.constant 0 : i32
    %c0_i32_1 = arith.constant 0 : i32
    return %c0_i32, %c0_i32_0 : i32, i32
  }
  func.func @transform_4(%arg0: i32, %arg1: i32) -> (i32, i32) {
    %c0_i32 = arith.constant 0 : i32
    %c0_i32_0 = arith.constant 0 : i32
    %c0_i32_1 = arith.constant 0 : i32
    return %c0_i32, %c0_i32_0 : i32, i32
  }
  func.func @transform_5(%arg0: i32, %arg1: i32) -> (i32, i32, i32) {
    %c0_i32 = arith.constant 0 : i32
    %c0_i32_0 = arith.constant 0 : i32
    return %arg0, %c0_i32, %arg1 : i32, i32, i32
  }
}

</mosaic_0001>

<bundles_post_ra>
// kernel: tpu_custom_call.1
= control target key start
LH: loop header
LB: loop body
LE: loop exit
PB: predicated region body
PF: predicated region fallthrough
CT: control target
= control target key end

     0   :  { %s840_s18 = smov 0   ;;  %s842_s19 = smov 0   ;;  %s904_s0 = inlined_call_operand.vmem [shape: bf16[2,8,8,7], index: 0, kind: input, shape index: {}]   ;;  %s905_s1 = inlined_call_operand.vmem [shape: bf16[7,16], index: 1, kind: input, shape index: {}]   ;;  %s906_s2 = inlined_call_operand.vmem [shape: f32[1,16], index: 2, kind: input, shape index: {}]   ;;  %s907_s3 = inlined_call_operand.vmem [shape: bf16[16,32], index: 3, kind: input, shape index: {}]   ;;  %s908_s4 = inlined_call_operand.vmem [shape: f32[1,32], index: 4, kind: input, shape index: {}]   ;;  %s909_s5 = inlined_call_operand.vmem [shape: f32[2,32,8], index: 5, kind: output, shape index: {}]  }
   0x1   :  { %s844_s20 = smov 0  }
   0x2 LB: > { %s27_s21 = sadd.s32 1, %s803_s19  ;;  %p700_p0 = scmp.ge.s32.totalorder %s807_s20, 1  ;;  %s807_s20 = sphi %s844_s20, %s15_s20   ;;  %s803_s19 = sphi %s842_s19, %s911_s19   ;;  %s799_s18 = sphi %s840_s18, %s910_s18  }
   0x3   : > { %p29_p1 = scmp.ge.s32.totalorder %s27_s21, 2  ;;  %p208_p2 = scmp.lt.s32.totalorder %s807_s20, 3 }
   0x5   : > { %s913_s21 = smov (%p29_p1, %s27_s21), 0  ;;  %p209_p3 = pnand %p700_p0, %p208_p2 }
   0x6   : > { %v270_v0 = vld [vmem:[%s905_s1] sm:$0xf] (!%p209_p3)  ;;  %vm311_vm0 = vcmask (!%p209_p3), 1042432   ;;  %vm312_vm1 = vcmask (!%p209_p3), 1043456   ;;  %p244_p4 = scmp.lt.s32.totalorder (!%p209_p3), %s799_s18, 1  ;;  %v809_v1 = vmov (!%p209_p3), 65535  }
   0x7   : > { %212 = sbr.rel (%p209_p3) target bundleno = 628 (0x274), region = 40  ;;  %v313_v2 = vsel (!%p209_p3), %vm311_vm0, 4294967295, %v809_v1  ;;  %vm298_vm2 = vcmask (!%p209_p3), 56320   ;;  %v784_v9 = vld [vmem:[%s907_s3] sm:$0xff] (!%p209_p3)   ;;  %vm410_vm3 = vcmask (!%p209_p3), 130048   ;;  %vm496_vm4 = vcmask (!%p209_p3), 261120  }
   0x8   : > { %v314_v3 = vsel (!%p209_p3), %vm312_vm1, %v313_v2, 0  ;;  %744 = vmatprep.subr.bf16.mxu1 (!%p209_p3), %v784_v9  ;;  %v705_v10 = vld [vmem:[%s906_s2] ss:$0 sm:$0xff] (!%p209_p3)  ;;  %vm561_vm5 = vcmask (!%p209_p3), 1041409   ;;  %vm563_vm6 = vcmask (!%p209_p3), 1042434   ;;  %vm565_vm7 = vcmask (!%p209_p3), 1043459  }
   0x9   : > { %v316_v4 = vand.u32 (!%p209_p3), %v314_v3, %v270_v0  ;;  %745 = vmatpush3.bf16.msra.mxu1 (!%p209_p3), %v784_v9  ;;  %v714_v39 = vld [vmem:[%s908_s4] ss:$0 sm:$0xff] (!%p209_p3)  ;;  %vm567_vm8 = vcmask (!%p209_p3), 1044484   ;;  %vm569_vm9 = vcmask (!%p209_p3), 1045509   ;;  %vm571_vm10 = vcmask (!%p209_p3), 1046534  }
   0xa   : > { %vm573_vm11 = vcmask (!%p209_p3), 1047559   ;;  %vm608_vm12 = vcmask (!%p209_p3), 64512  }
   0xb   : > { %734 = vmatprep.subr.bf16.mxu0 (!%p209_p3), %v316_v4 }
   0xc   : > { %735 = vmatpush3.bf16.msra.mxu0 (!%p209_p3), %v316_v4 }
   0xe   : > { %s915_s18 = smov (!%p244_p4, %s799_s18), 1 }
   0xf   : > { %s722_s24 = sshll.u32 %s915_s18, 5 }
  0x10   : > { %s251_s27 = scalar_lea.vmem %s904_s0, %s722_s24  ;;  %s260_s11 = scalar_lea.vmem %s909_s5, %s722_s24 }
  0x11   : > { %v780_v5 = vld [vmem:[%s251_s27] sm:$0xff]   ;;  %v781_v6 = vld [vmem:[%s251_s27 + $0x8] sm:$0xff]   ;;  %v782_v7 = vld [vmem:[%s251_s27 + $0x10] sm:$0xff]  }
  0x12   : > { %736 = vmatprep.mubr.msk.bf16.mxu0 %vm298_vm2, %v780_v5  ;;  %v783_v8 = vld [vmem:[%s251_s27 + $0x18] sm:$0xff]  }
  0x13   : > { %737 = vmatmul.mubr.msk.bf16.vlgmr.msra.gmra.mrb[0].mxu0 %vm298_vm2, %v781_v6 }
  0x14   : > { %740 = vmatprep.mubr.msk.bf16.mxu0 %vm298_vm2, %v782_v7 }
  0x1b   : > { %741 = vmatmul.mubr.msk.bf16.gmra.mrb[4].mxu0 %vm298_vm2, %v783_v8 }
  0xe6   : > { %v738_v11 = vpop.f32.mrb[0].mxu0 }
  0xe7   : > { %v361_v12 = vadd.f32 %v738_v11, %v705_v10  ;;  %v352_v13 = vpop.f32.mrb[1].mxu0 }
  0xe8   : > { %v353_v14 = vadd.f32 %v705_v10, %v352_v13  ;;  %v739_v15 = vpop.f32.mrb[2].mxu0 }
  0xe9   : > { %v364_v16 = vadd.f32 %v739_v15, %v705_v10  ;;  %v355_v17 = vpop.f32.mrb[3].mxu0  ;;  %v385_v19 = vmax.f32 %v361_v12, 0.0 }
  0xea   : > { %v356_v18 = vadd.f32 %v705_v10, %v355_v17  ;;  %v383_v21 = vmax.f32 %v353_v14, 0.0 }
  0xeb   : > { %v386_v20 = vmax.f32 %v364_v16, 0.0 }
  0xec   : > { %v384_v22 = vmax.f32 %v356_v18, 0.0 }
  0xed   : > { %v392_v23 = vpack.c.bf16 %v386_v20, %v385_v19 }
  0xee   : > { %v742_v24 = vpop.f32.mrb[4].mxu0  ;;  %v391_v25 = vpack.c.bf16 %v384_v22, %v383_v21 }
  0xef   : > { %v377_v26 = vadd.f32 %v742_v24, %v705_v10  ;;  %v368_v27 = vpop.f32.mrb[5].mxu0 }
  0xf0   : > { %v369_v28 = vadd.f32 %v705_v10, %v368_v27  ;;  %v743_v29 = vpop.f32.mrb[6].mxu0  ;;  %746 = vmatprep.mubr.msk.bf16.mxu1 %vm410_vm3, %v391_v25 }
  0xf1   : > { %v380_v30 = vadd.f32 %v743_v29, %v705_v10  ;;  %v371_v31 = vpop.f32.mrb[7].mxu0  ;;  %747 = vmatmul.mubr.msk.bf16.vlgmr.msra.gmra.mrb[0].mxu1 %vm410_vm3, %v392_v23  ;;  %v389_v33 = vmax.f32 %v377_v26, 0.0 }
  0xf2   : > { %v372_v32 = vadd.f32 %v705_v10, %v371_v31  ;;  %v387_v35 = vmax.f32 %v369_v28, 0.0 }
  0xf3   : > { %v390_v34 = vmax.f32 %v380_v30, 0.0 }
  0xf4   : > { %v388_v36 = vmax.f32 %v372_v32, 0.0 }
  0xf5   : > { %v394_v37 = vpack.c.bf16 %v390_v34, %v389_v33 }
  0xf6   : > { %v393_v38 = vpack.c.bf16 %v388_v36, %v387_v35 }
  0xf8   : > { %750 = vmatprep.mubr.msk.bf16.mxu1 %vm410_vm3, %v393_v38 }
  0xf9   : > { %751 = vmatmul.mubr.msk.bf16.gmra.mrb[4].mxu1 %vm410_vm3, %v394_v37 }
 0x1c4   : > { %v748_v40 = vpop.f32.mrb[0].mxu1 }
 0x1c5   : > { %v466_v41 = vadd.f32 %v748_v40, %v714_v39  ;;  %v457_v42 = vpop.f32.mrb[1].mxu1 }
 0x1c6   : > { %v458_v43 = vadd.f32 %v714_v39, %v457_v42  ;;  %v749_v44 = vpop.f32.mrb[2].mxu1 }
 0x1c7   : > { %v490_v45 = vmax.f32 %v466_v41, 0.0  ;;  %v469_v46 = vadd.f32 %v749_v44, %v714_v39  ;;  %v460_v47 = vpop.f32.mrb[3].mxu1 }
 0x1c8   : > { %v488_v48 = vmax.f32 %v458_v43, 0.0  ;;  %v461_v49 = vadd.f32 %v714_v39, %v460_v47 }
 0x1c9   : > { %v511_v50 = vsel %vm496_vm4, %v490_v45, -inf  ;;  %v491_v51 = vmax.f32 %v469_v46, 0.0 }
 0x1ca   : > { %v512_v52 = vrot.slane %v511_v50, 4  ;;  %v497_v53 = vsel %vm496_vm4, %v488_v48, -inf  ;;  %v489_v54 = vmax.f32 %v461_v49, 0.0 }
 0x1cb   : > { %v498_v55 = vrot.slane %v497_v53, 4  ;;  %v518_v56 = vsel %vm496_vm4, %v491_v51, -inf }
 0x1cc   : > { %v513_v57 = vmax.f32 %v511_v50, %v512_v52  ;;  %v519_v58 = vrot.slane %v518_v56, 4  ;;  %v504_v59 = vsel %vm496_vm4, %v489_v54, -inf  ;;  %v752_v60 = vpop.f32.mrb[4].mxu1 }
 0x1cd   : > { %v499_v61 = vmax.f32 %v497_v53, %v498_v55  ;;  %v505_v62 = vrot.slane %v504_v59, 4  ;;  %v482_v63 = vadd.f32 %v752_v60, %v714_v39  ;;  %v473_v0 = vpop.f32.mrb[5].mxu1 }
 0x1ce   : > { %v514_v1 = vrot.slane %v513_v57, 2  ;;  %v520_v2 = vmax.f32 %v518_v56, %v519_v58  ;;  %v474_v3 = vadd.f32 %v714_v39, %v473_v0  ;;  %v753_v4 = vpop.f32.mrb[6].mxu1 }
 0x1cf   : > { %v500_v5 = vrot.slane %v499_v61, 2  ;;  %v506_v6 = vmax.f32 %v504_v59, %v505_v62  ;;  %v494_v7 = vmax.f32 %v482_v63, 0.0  ;;  %v485_v8 = vadd.f32 %v753_v4, %v714_v39  ;;  %v476_v9 = vpop.f32.mrb[7].mxu1 }
 0x1d0   : > { %v515_v10 = vmax.f32 %v513_v57, %v514_v1  ;;  %v521_v11 = vrot.slane %v520_v2, 2  ;;  %v492_v12 = vmax.f32 %v474_v3, 0.0  ;;  %v477_v13 = vadd.f32 %v714_v39, %v476_v9 }
 0x1d1   : > { %v501_v14 = vmax.f32 %v499_v61, %v500_v5  ;;  %v507_v15 = vrot.slane %v506_v6, 2  ;;  %v539_v16 = vsel %vm496_vm4, %v494_v7, -inf  ;;  %v495_v17 = vmax.f32 %v485_v8, 0.0 }
 0x1d2   : > { %v522_v18 = vmax.f32 %v520_v2, %v521_v11  ;;  %v540_v19 = vrot.slane %v539_v16, 4  ;;  %v525_v20 = vsel %vm496_vm4, %v492_v12, -inf  ;;  %v516_v25 = vrot.slane %v515_v10, 1 }
 0x1d3   : > { %v502_v21 = vrot.slane %v501_v14, 1  ;;  %v508_v22 = vmax.f32 %v506_v6, %v507_v15  ;;  %v526_v23 = vrot.slane %v525_v20, 4  ;;  %v546_v24 = vsel %vm496_vm4, %v495_v17, -inf }
 0x1d4   : > { %v541_v26 = vmax.f32 %v539_v16, %v540_v19  ;;  %v547_v27 = vrot.slane %v546_v24, 4  ;;  %v523_v28 = vrot.slane %v522_v18, 1  ;;  %v493_v31 = vmax.f32 %v477_v13, 0.0 }
 0x1d5   : > { %v509_v29 = vrot.slane %v508_v22, 1  ;;  %v527_v30 = vmax.f32 %v525_v20, %v526_v23  ;;  %v503_v32 = vmax.f32 %v501_v14, %v502_v21  ;;  %v517_v38 = vmax.f32 %v515_v10, %v516_v25 }
 0x1d6   : > { %v548_v33 = vmax.f32 %v546_v24, %v547_v27  ;;  %v542_v35 = vrot.slane %v541_v26, 2  ;;  %v532_v37 = vsel %vm496_vm4, %v493_v31, -inf  ;;  %v524_v41 = vmax.f32 %v522_v18, %v523_v28 }
 0x1d7   : > { %v510_v34 = vmax.f32 %v508_v22, %v509_v29  ;;  %v528_v36 = vrot.slane %v527_v30, 2  ;;  %v533_v40 = vrot.slane %v532_v37, 4 }
 0x1d8   : > { %v549_v39 = vrot.slane %v548_v33, 2  ;;  %v543_v46 = vmax.f32 %v541_v26, %v542_v35 }
 0x1d9   : > { %v562_v42 = vsel %vm561_vm5, %v510_v34, %v503_v32  ;;  %v529_v43 = vmax.f32 %v527_v30, %v528_v36  ;;  %v534_v44 = vmax.f32 %v532_v37, %v533_v40 }
 0x1da   : > { %v564_v45 = vsel %vm563_vm6, %v517_v38, %v562_v42  ;;  %v550_v49 = vmax.f32 %v548_v33, %v549_v39  ;;  %v544_v53 = vrot.slane %v543_v46, 1 }
 0x1db   : > { %v530_v47 = vrot.slane %v529_v43, 1  ;;  %v566_v48 = vsel %vm565_vm7, %v524_v41, %v564_v45  ;;  %v535_v50 = vrot.slane %v534_v44, 2 }
 0x1dc   : > { %v551_v56 = vrot.slane %v550_v49, 1  ;;  %v545_v58 = vmax.f32 %v543_v46, %v544_v53 }
 0x1dd   : > { %v531_v51 = vmax.f32 %v529_v43, %v530_v47  ;;  %v536_v52 = vmax.f32 %v534_v44, %v535_v50 }
 0x1de   : > { %v552_v59 = vmax.f32 %v550_v49, %v551_v56 }
 0x1df   : > { %v568_v54 = vsel %vm567_vm8, %v531_v51, %v566_v48  ;;  %v537_v55 = vrot.slane %v536_v52, 1 }
 0x1e1   : > { %v538_v57 = vmax.f32 %v536_v52, %v537_v55 }
 0x1e3   : > { %v570_v60 = vsel %vm569_vm9, %v538_v57, %v568_v54 }
 0x1e4   : > { %v572_v61 = vsel %vm571_vm10, %v545_v58, %v570_v60 }
 0x1e5   : > { %v574_v62 = vsel %vm573_vm11, %v552_v59, %v572_v61 }
 0x1e6   : > { %576 = vxpose.xlu0.b32.start.end [1/1] (short) (narrow) %v574_v62, 32 }
 0x266   : > { %v592_v63 = vpop.trf.xlu0 }
 0x267   : > { %609 = vst.msk [vmem:[%s260_s11] sm:$0xff] %vm608_vm12, %v592_v63 }
 0x26a   : > { %v593_v0 = vpop.trf.xlu0 }
 0x26b   : > { %610 = vst.msk [vmem:[%s260_s11 + $0x8] sm:$0xff] %vm608_vm12, %v593_v0 }
 0x26e   : > { %v594_v1 = vpop.trf.xlu0 }
 0x26f   : > { %611 = vst.msk [vmem:[%s260_s11 + $0x10] sm:$0xff] %vm608_vm12, %v594_v1 }
 0x272   : > { %v595_v2 = vpop.trf.xlu0 }
 0x273   : > { %612 = vst.msk [vmem:[%s260_s11 + $0x18] sm:$0xff] %vm608_vm12, %v595_v2 }
 0x274 PF: > { %s15_s20 = sadd.s32 1, %s807_s20   ;;  %s910_s18 = smov %s803_s19 }
 0x275   : > { %p12_p5 = scmp.ge.s32.totalorder %s15_s20, 4   ;;  %s911_s19 = smov %s913_s21 }
 0x277   :  { %14 = sbr.rel (!%p12_p5) target bundleno = 2 (0x2), region = 70 }

</bundles_post_ra>
